<compile_context>
chip_gen: v7x
topology: tpu7x:2x2x1
jax: 0.10.0
libtpu: 0.0.40
codegen_flags: <defaults>
</compile_context>

<pallas_src>
import functools

import jax
import jax.numpy as jnp
from jax.experimental import pallas as pl
from jax.experimental.pallas import tpu as pltpu


def _round_up(x, m):
    return -(-x // m) * m


def _vmem_capacity_bytes():
    try:
        info = pltpu.get_tpu_info()
        cap = getattr(info, "vmem_capacity_bytes", None)
        if cap:
            return int(cap)
    except Exception:
        pass
    return 64 << 20  # conservative default (v7x per-core VMEM)


def _pick_cout_tile(c_out):
    if c_out <= 256:
        return c_out
    # v6e/v7x MXU is 2x256^2 -> prefer 256-tall output tiles (128 still fills v5e).
    for tc in (256, 128):
        if c_out % tc == 0:
            return tc
    return c_out  # no nice divisor: single full-height tile


def _pick_time_tile(t_len, fits):
    if t_len <= 2048 and fits(t_len):
        return t_len  # single full-T block (BlockSpec-legal even if not 128-multiple)
    for tt in (8192, 4096, 2048, 1024, 512, 256, 128):
        if tt <= t_len and t_len % tt == 0 and fits(tt):
            return tt
    for tt in (512, 256, 128):
        if t_len % tt == 0:
            return tt
    # TODO(synk): mask a final partial time tile instead of falling back to full-T blocks.
    return t_len


def _causal_conv1d_kernel(x_ref, w_ref, b_ref, o_ref, xbuf_ref, *,
                          kernel_size, dilation, pad, pad_aligned, time_tile,
                          c_in, cout_tile, n_cout_tiles, weight_resident):
    """One (batch, time-tile, c_out-tile) grid step.

    x_ref   : (C_in, tT)                  current input time tile
    w_ref   : (K, C_out, C_in) resident   or (K, tCo, C_in) tiled per-tap weights
    b_ref   : (tCo, 1) f32                bias
    o_ref   : (tCo, tT)                   output tile
    xbuf_ref: (C_in, P + tT) VMEM carry   [0:P) halo region (last p cols valid),
                                          [P:P+tT) current tile; P = roundup(p,128)
                                          so the big store below is lane-aligned.
    """
    K, dil, p, P, tT = kernel_size, dilation, pad, pad_aligned, time_tile
    t = pl.program_id(1)
    co = pl.program_id(2)

    if weight_resident and n_cout_tiles > 1:
        w_off = pl.multiple_of(co * cout_tile, cout_tile)

    def tap_weight(k):
        if weight_resident and n_cout_tiles > 1:
            return w_ref[k, pl.ds(w_off, cout_tile), :]        # (tCo, C_in)
        return w_ref[k]                                        # (tCo, C_in)

    if p == 0:
        # K == 1: pointwise conv == plain channel matmul, no halo needed.
        acc = jnp.dot(tap_weight(0), x_ref[...],
                      preferred_element_type=jnp.float32)
    else:
        # ---- stage input once per time tile (first c_out tile only) ------------
        @pl.when(jnp.logical_and(co == 0, t == 0))
        def _zero_halo():          # causal head of every batch's time sweep
            xbuf_ref[:, 0:P] = jnp.zeros((c_in, P), xbuf_ref.dtype)

        @pl.when(co == 0)
        def _stage():              # lane-aligned (P % 128 == 0) unmasked store
            xbuf_ref[:, P:P + tT] = x_ref[...]

        # ---- K accumulating MXU matmuls over shifted windows --------------------
        # y[:, j] = sum_k w_k @ x[:, t0 + j - p + k*d]; x[:, t0+m] lives in column
        # P+m of xbuf, so tap k reads the static window [P - p + k*d, +tT).
        acc = None
        for k in range(K):
            start = P - p + k * dil
            window = xbuf_ref[:, start:start + tT]             # (C_in, tT)
            partial = jnp.dot(tap_weight(k), window,
                              preferred_element_type=jnp.float32)
            acc = partial if acc is None else acc + partial

        # ---- carry last p input samples to the next time tile (last c_out tile,
        #      after all taps above have read the buffer) ------------------------
        @pl.when(co == n_cout_tiles - 1)
        def _carry():
            tail = xbuf_ref[:, P + tT - p:P + tT]              # load first (value)
            xbuf_ref[:, P - p:P] = tail

    o_ref[...] = (acc + b_ref[...]).astype(o_ref.dtype)


def causal_conv1d(x, weight, bias, *, dilation=1, out_dtype=None, time_tile=None):
    """x: (B, C_in, T), weight: (C_out, C_in, K), bias: (C_out,) -> (B, C_out, T)."""
    B, C_in, T = x.shape
    C_out, C_in_w, K = weight.shape
    assert C_in == C_in_w, (C_in, C_in_w)
    assert dilation >= 1
    p = (K - 1) * dilation
    P = _round_up(p, 128) if p > 0 else 0

    cdt = x.dtype                      # compute dtype follows x (no wrapper x cast)
    odt = jnp.dtype(out_dtype) if out_dtype is not None else x.dtype

    # (C_out, C_in, K) -> (K, C_out, C_in): per-tap weight planes (tiny, cast is free).
    w_taps = jnp.transpose(weight, (2, 0, 1)).astype(cdt)
    bias2d = bias.reshape(C_out, 1).astype(jnp.float32)

    lane = 128
    in_b = jnp.dtype(cdt).itemsize
    out_b = jnp.dtype(odt).itemsize
    sub_in = max(8, 32 // max(in_b, 1))
    sub_out = max(8, 32 // max(out_b, 1))

    tCo = _pick_cout_tile(C_out)
    nCo = C_out // tCo

    # Keep the whole weight VMEM-resident (constant index map) when it fits easily.
    w_buf_bytes = K * _round_up(C_out, sub_in) * max(_round_up(C_in, lane), lane) * in_b
    weight_resident = w_buf_bytes <= (8 << 20)

    def _vmem_est(tt):
        ttp = max(_round_up(tt, lane), lane)
        x_tile = _round_up(C_in, sub_in) * ttp * in_b
        o_tile = _round_up(tCo, sub_out) * ttp * out_b
        if weight_resident:
            w_bytes = 2 * w_buf_bytes
        else:
            w_bytes = 2 * K * _round_up(tCo, sub_in) * max(_round_up(C_in, lane), lane) * in_b
        b_bytes = 2 * _round_up(tCo, 8) * lane * 4
        xbuf = (_round_up(C_in, sub_in) * max(_round_up(P + tt, lane), lane) * in_b
                if p > 0 else 8 * lane * in_b)
        return 2 * x_tile + 2 * o_tile + w_bytes + b_bytes + xbuf

    cap = _vmem_capacity_bytes()
    if cap >= (100 << 20):                       # v5e / v6e: 128 MiB VMEM
        vmem_limit = 96 << 20
        tile_budget = 64 << 20
    else:                                        # v7x: 64 MiB -> leave compiler headroom
        vmem_limit = max(32 << 20, min(52 << 20, cap - (12 << 20)))
        tile_budget = 28 << 20

    if time_tile is None:
        tT = _pick_time_tile(T, lambda tt: _vmem_est(tt) <= tile_budget)
    else:
        tT = int(time_tile)
    assert T % tT == 0, f"time tile {tT} must divide T={T}"
    nT = T // tT

    vmem_limit = int(min(max(vmem_limit, _vmem_est(tT) + (16 << 20)),
                         max(cap - (8 << 20), 32 << 20)))

    kernel = functools.partial(
        _causal_conv1d_kernel,
        kernel_size=K, dilation=dilation, pad=p, pad_aligned=P, time_tile=tT,
        c_in=C_in, cout_tile=tCo, n_cout_tiles=nCo, weight_resident=weight_resident,
    )

    if weight_resident:
        w_spec = pl.BlockSpec((K, C_out, C_in), lambda b, t, co: (0, 0, 0))
    else:
        w_spec = pl.BlockSpec((K, tCo, C_in), lambda b, t, co: (0, co, 0))

    xbuf_shape = (C_in, P + tT) if p > 0 else (8, 128)

    return pl.pallas_call(
        kernel,
        out_shape=jax.ShapeDtypeStruct((B, C_out, T), odt),
        grid_spec=pltpu.PrefetchScalarGridSpec(
            num_scalar_prefetch=0,
            # c_out tiles innermost so the x tile / halo staging is reused across them.
            grid=(B, nT, nCo),
            in_specs=[
                # batch dim squeezed -> kernel sees (C_in, tT); constant across co.
                pl.BlockSpec((None, C_in, tT), lambda b, t, co: (b, 0, t)),
                w_spec,
                pl.BlockSpec((tCo, 1), lambda b, t, co: (co, 0)),
            ],
            out_specs=pl.BlockSpec((None, tCo, tT), lambda b, t, co: (b, co, t)),
            scratch_shapes=[pltpu.VMEM(xbuf_shape, cdt)],
        ),
        compiler_params=pltpu.CompilerParams(
            # time and c_out MUST stay sequential (halo carry lives in per-core VMEM
            # scratch); only the batch axis is megacore-parallel.
            dimension_semantics=("parallel", "arbitrary", "arbitrary"),
            vmem_limit_bytes=vmem_limit,
        ),
    )(x, w_taps, bias2d)


def _reference_causal_conv1d(x, weight, bias, *, dilation=1):
    """Pure-JAX reference matching PyTorch CausalConv1d.forward."""
    K = weight.shape[-1]
    padding = (K - 1) * dilation
    y = jax.lax.conv_general_dilated(
        x, weight,
        window_strides=(1,),
        padding=[(padding, padding)],
        rhs_dilation=(dilation,),
        dimension_numbers=("NCH", "OIH", "NCH"),
        precision=jax.lax.Precision.HIGHEST,
    )
    y = y + bias.reshape(1, -1, 1)
    if padding != 0:
        y = y[:, :, :-padding]
    return y


def _run_case(key, B, C_in, C_out, T, K, d, *, time_tile=None, x_dtype=jnp.float32,
              atol=2e-3, rtol=2e-3):
    kx, kw, kb = jax.random.split(key, 3)
    x = jax.random.normal(kx, (B, C_in, T), dtype=jnp.float32).astype(x_dtype)
    w = jax.random.normal(kw, (C_out, C_in, K), dtype=jnp.float32) * 0.1
    b = jax.random.normal(kb, (C_out,), dtype=jnp.float32) * 0.1

    y = causal_conv1d(x, w, b, dilation=d, time_tile=time_tile)
    y = jax.block_until_ready(y)
    assert y.shape == (B, C_out, T), y.shape
    assert y.dtype == x.dtype, y.dtype

    y_ref = _reference_causal_conv1d(x.astype(jnp.float32), w, b, dilation=d)
    err = float(jnp.max(jnp.abs(y.astype(jnp.float32) - y_ref)))
    tol = atol + rtol * float(jnp.max(jnp.abs(y_ref)))
    assert err <= tol, f"max abs err {err} > tol {tol}"


if __name__ == "__main__":
    key = jax.random.PRNGKey(0)
    k1, k2, k3, k4 = jax.random.split(key, 4)

    # 1) Small shapes consistent with CausalConv1d(in=4, out=8, kernel=3, dilation=2).
    _run_case(k1, B=2, C_in=4, C_out=8, T=16, K=3, d=2)

    # 2) Time-tiled path: 4 time tiles of 128 -> exercises the cross-tile halo carry.
    _run_case(k2, B=2, C_in=8, C_out=16, T=512, K=2, d=3, time_tile=128)

    # 3) bf16 input (bf16 MXU operands, f32 accumulation + bias epilogue), tiled.
    _run_case(k3, B=2, C_in=8, C_out=16, T=512, K=3, d=4, time_tile=128,
              x_dtype=jnp.bfloat16, atol=5e-2, rtol=5e-2)

    # 4) Multiple c_out tiles (nCo=2): exercises the co-innermost grid, the pl.when
    #    staging/carry gates and the resident-weight dynamic c_out slice.
    _run_case(k4, B=2, C_in=8, C_out=512, T=256, K=3, d=2, time_tile=128)

    print("KERNEL_OK")
</pallas_src>

<mosaic_0001>
module attributes {stable_mosaic.version = 11 : i64} {
  func.func @_causal_conv1d_kernel(%arg0: i32, %arg1: i32, %arg2: i32, %arg3: memref<1x4x16xf32, #tpu.memory_space<vmem>>, %arg4: memref<3x8x4xf32, #tpu.memory_space<vmem>>, %arg5: memref<8x1xf32, #tpu.memory_space<vmem>>, %arg6: memref<1x8x16xf32, #tpu.memory_space<vmem>>, %arg7: memref<4x144xf32, #tpu.memory_space<vmem>>) attributes {dimension_semantics = [#tpu.dimension_semantics<parallel>, #tpu.dimension_semantics<arbitrary>, #tpu.dimension_semantics<arbitrary>], iteration_bounds = array<i64: 2, 1, 1>, scalar_prefetch = 0 : i64, scratch_operands = 1 : i64, tpu.core_type = #tpu.core_type<tc>, window_params = [{transform_indices = @transform_0, window_bounds = array<i64: 1, 4, 16>}, {pipeline_mode = #tpu.pipeline_mode<synchronous>, transform_indices = @transform_1, window_bounds = array<i64: 3, 8, 4>}, {transform_indices = @transform_2, window_bounds = array<i64: 8, 1>}, {transform_indices = @transform_3, window_bounds = array<i64: 1, 8, 16>}]} {
    %c0_i32 = arith.constant 0 : i32
    %0 = arith.cmpi eq, %arg2, %c0_i32 : i32
    %c0_i32_0 = arith.constant 0 : i32
    %1 = arith.cmpi eq, %arg1, %c0_i32_0 : i32
    %2 = arith.andi %0, %1 : i1
    %3 = arith.extui %2 : i1 to i32
    %c0_i32_1 = arith.constant 0 : i32
    %4 = arith.cmpi ne, %3, %c0_i32_1 : i32
    scf.if %4 {
      %cst_22 = arith.constant 0.000000e+00 : f32
      %31 = vector.broadcast %cst_22 : f32 to vector<4x128xf32>
      %c0_23 = arith.constant 0 : index
      %c0_24 = arith.constant 0 : index
      %32 = vector.load %arg7[%c0_23, %c0_24] : memref<4x144xf32, #tpu.memory_space<vmem>>, vector<4x128xf32>
      tpu.vector_store %arg7[%c0_23, %c0_24], %31 {strides = array<i32>} : memref<4x144xf32, #tpu.memory_space<vmem>>, vector<4x128xf32>,
    } else {
    }
    %c0_i32_2 = arith.constant 0 : i32
    %5 = arith.cmpi eq, %arg2, %c0_i32_2 : i32
    %6 = arith.extui %5 : i1 to i32
    %c0_i32_3 = arith.constant 0 : i32
    %7 = arith.cmpi ne, %6, %c0_i32_3 : i32
    scf.if %7 {
      %c0_22 = arith.constant 0 : index
      %c0_23 = arith.constant 0 : index
      %c0_24 = arith.constant 0 : index
      %31 = vector.load %arg3[%c0_22, %c0_23, %c0_24] : memref<1x4x16xf32, #tpu.memory_space<vmem>>, vector<1x4x16xf32>
      %32 = vector.shape_cast %31 : vector<1x4x16xf32> to vector<4x16xf32>
      %c0_25 = arith.constant 0 : index
      %c128_26 = arith.constant 128 : index
      %33 = vector.load %arg7[%c0_25, %c128_26] : memref<4x144xf32, #tpu.memory_space<vmem>>, vector<4x16xf32>
      tpu.vector_store %arg7[%c0_25, %c128_26], %32 {strides = array<i32>} : memref<4x144xf32, #tpu.memory_space<vmem>>, vector<4x16xf32>,
    } else {
    }
    %c0 = arith.constant 0 : index
    %c124 = arith.constant 124 : index
    %8 = vector.load %arg7[%c0, %c124] : memref<4x144xf32, #tpu.memory_space<vmem>>, vector<4x16xf32>
    %c0_4 = arith.constant 0 : index
    %c0_5 = arith.constant 0 : index
    %c0_6 = arith.constant 0 : index
    %9 = vector.load %arg4[%c0_4, %c0_5, %c0_6] : memref<3x8x4xf32, #tpu.memory_space<vmem>>, vector<1x8x4xf32>
    %10 = vector.shape_cast %9 : vector<1x8x4xf32> to vector<8x4xf32>
    %cst = arith.constant dense<0.000000e+00> : vector<8x16xf32>
    %11 = tpu.matmul %10, %8, %cst {dimension_numbers = #tpu.dot_dimension_numbers<[1], [0], [0], [1], [0, 0, 1, 1], [], []>} : vector<8x4xf32>, vector<4x16xf32>, vector<8x16xf32> -> vector<8x16xf32>
    %c0_7 = arith.constant 0 : index
    %c126 = arith.constant 126 : index
    %12 = vector.load %arg7[%c0_7, %c126] : memref<4x144xf32, #tpu.memory_space<vmem>>, vector<4x16xf32>
    %c1 = arith.constant 1 : index
    %c0_8 = arith.constant 0 : index
    %c0_9 = arith.constant 0 : index
    %13 = vector.load %arg4[%c1, %c0_8, %c0_9] : memref<3x8x4xf32, #tpu.memory_space<vmem>>, vector<1x8x4xf32>
    %14 = vector.shape_cast %13 : vector<1x8x4xf32> to vector<8x4xf32>
    %cst_10 = arith.constant dense<0.000000e+00> : vector<8x16xf32>
    %15 = tpu.matmul %14, %12, %cst_10 {dimension_numbers = #tpu.dot_dimension_numbers<[1], [0], [0], [1], [0, 0, 1, 1], [], []>} : vector<8x4xf32>, vector<4x16xf32>, vector<8x16xf32> -> vector<8x16xf32>
    %16 = arith.addf %11, %15 : vector<8x16xf32>
    %c0_11 = arith.constant 0 : index
    %c128 = arith.constant 128 : index
    %17 = vector.load %arg7[%c0_11, %c128] : memref<4x144xf32, #tpu.memory_space<vmem>>, vector<4x16xf32>
    %c2 = arith.constant 2 : index
    %c0_12 = arith.constant 0 : index
    %c0_13 = arith.constant 0 : index
    %18 = vector.load %arg4[%c2, %c0_12, %c0_13] : memref<3x8x4xf32, #tpu.memory_space<vmem>>, vector<1x8x4xf32>
    %19 = vector.shape_cast %18 : vector<1x8x4xf32> to vector<8x4xf32>
    %cst_14 = arith.constant dense<0.000000e+00> : vector<8x16xf32>
    %20 = tpu.matmul %19, %17, %cst_14 {dimension_numbers = #tpu.dot_dimension_numbers<[1], [0], [0], [1], [0, 0, 1, 1], [], []>} : vector<8x4xf32>, vector<4x16xf32>, vector<8x16xf32> -> vector<8x16xf32>
    %21 = arith.addf %16, %20 : vector<8x16xf32>
    %c0_i32_15 = arith.constant 0 : i32
    %22 = arith.cmpi eq, %arg2, %c0_i32_15 : i32
    %23 = arith.extui %22 : i1 to i32
    %c0_i32_16 = arith.constant 0 : i32
    %24 = arith.cmpi ne, %23, %c0_i32_16 : i32
    scf.if %24 {
      %c0_22 = arith.constant 0 : index
      %c140 = arith.constant 140 : index
      %31 = vector.load %arg7[%c0_22, %c140] : memref<4x144xf32, #tpu.memory_space<vmem>>, vector<4x4xf32>
      %c0_23 = arith.constant 0 : index
      %c124_24 = arith.constant 124 : index
      %32 = vector.load %arg7[%c0_23, %c124_24] : memref<4x144xf32, #tpu.memory_space<vmem>>, vector<4x4xf32>
      tpu.vector_store %arg7[%c0_23, %c124_24], %31 {strides = array<i32>} : memref<4x144xf32, #tpu.memory_space<vmem>>, vector<4x4xf32>,
    } else {
    }
    %c0_17 = arith.constant 0 : index
    %c0_18 = arith.constant 0 : index
    %25 = vector.load %arg5[%c0_17, %c0_18] : memref<8x1xf32, #tpu.memory_space<vmem>>, vector<8x1xf32>
    %26 = vector.broadcast %25 : vector<8x1xf32> to vector<8x16xf32>
    %27 = arith.addf %21, %26 : vector<8x16xf32>
    %c0_19 = arith.constant 0 : index
    %c0_20 = arith.constant 0 : index
    %c0_21 = arith.constant 0 : index
    %28 = vector.load %arg6[%c0_19, %c0_20, %c0_21] : memref<1x8x16xf32, #tpu.memory_space<vmem>>, vector<1x8x16xf32>
    %29 = vector.shape_cast %28 : vector<1x8x16xf32> to vector<8x16xf32>
    %30 = vector.shape_cast %27 : vector<8x16xf32> to vector<1x8x16xf32>
    tpu.vector_store %arg6[%c0_19, %c0_20, %c0_21], %30 {strides = array<i32>} : memref<1x8x16xf32, #tpu.memory_space<vmem>>, vector<1x8x16xf32>,
    return
  }
  func.func @transform_0(%arg0: i32, %arg1: i32, %arg2: i32) -> (i32, i32, i32) {
    %c0_i32 = arith.constant 0 : i32
    %c0_i32_0 = arith.constant 0 : i32
    return %arg0, %c0_i32, %arg1 : i32, i32, i32
  }
  func.func @transform_1(%arg0: i32, %arg1: i32, %arg2: i32) -> (i32, i32, i32) {
    %c0_i32 = arith.constant 0 : i32
    %c0_i32_0 = arith.constant 0 : i32
    %c0_i32_1 = arith.constant 0 : i32
    %c0_i32_2 = arith.constant 0 : i32
    return %c0_i32, %c0_i32_0, %c0_i32_1 : i32, i32, i32
  }
  func.func @transform_2(%arg0: i32, %arg1: i32, %arg2: i32) -> (i32, i32) {
    %c0_i32 = arith.constant 0 : i32
    %c0_i32_0 = arith.constant 0 : i32
    return %arg2, %c0_i32 : i32, i32
  }
  func.func @transform_3(%arg0: i32, %arg1: i32, %arg2: i32) -> (i32, i32, i32) {
    %c0_i32 = arith.constant 0 : i32
    return %arg0, %arg2, %arg1 : i32, i32, i32
  }
}

</mosaic_0001>

<bundles_post_ra>
// kernel: tpu_custom_call.1
= control target key start
LH: loop header
LB: loop body
LE: loop exit
PB: predicated region body
PF: predicated region fallthrough
CT: control target
= control target key end

     0   :  { %8 = vsyncpa [#allocation4], 0  ;;  %s946_s0 = inlined_call_operand.vmem [shape: f32[2,4,16], index: 0, kind: input, shape index: {}]   ;;  %s947_s1 = inlined_call_operand.vmem [shape: f32[3,8,4], index: 1, kind: input, shape index: {}]   ;;  %s948_s2 = inlined_call_operand.vmem [shape: f32[8,1], index: 2, kind: input, shape index: {}]   ;;  %s949_s3 = inlined_call_operand.hbm [shape: f32[2,8,16], index: 3, kind: output, shape index: {}]  }
   0x1   :  { %10 = vsyncpa [#allocation4 + $0x1], 0  ;;  %s815_s12 = smov 0   ;;  %s817_s13 = smov 0  }
   0x2   :  { %s819_s14 = smov 0   ;;  %s821_s15 = smov 0  }
   0x3   :  { %s823_s16 = smov 0   ;;  %s825_s17 = smov 0  }
   0x4 LB: > { %s604_s18 = sadd.s32 4294967295, %s786_s17   ;;  %s605_s19 = sadd.s32 4294967294, %s786_s17   ;;  %s786_s17 = sphi %s825_s17, %s16_s17   ;;  %s782_s16 = sphi %s823_s16, %s956_s16   ;;  %s778_s15 = sphi %s821_s15, %s955_s15   ;;  %s774_s14 = sphi %s819_s14, %s954_s14   ;;  %s770_s13 = sphi %s817_s13, %s953_s13   ;;  %s766_s12 = sphi %s815_s12, %s952_s12  }
   0x5   : > { %s35_s20 = sadd.s32 1, %s782_s16  ;;  %s121_s21 = sadd.s32 1, %s774_s14 }
   0x6   : > { %p37_p0 = scmp.ge.s32.totalorder %s35_s20, 2  ;;  %p131_p1 = scmp.ne.s32.totalorder %s774_s14, %s770_s13 }
   0x7   : > { %p132_p2 = scmp.eq.s32.totalorder %s604_s18, 1  ;;  %p137_p3 = scmp.ne.s32.totalorder %s770_s13, %s766_s12 }
   0x8   : > { %s958_s20 = smov (%p37_p0, %s35_s20), 0  ;;  %p138_p5 = scmp.eq.s32.totalorder %s605_s19, 1 }
   0x9   : > { %p855_p4 = por %p132_p2, %p131_p1  ;;  %s114_s23 = ssub.s32 %s782_s16, %s958_s20 }
   0xa   : > { %p609_p6 = scmp.ge.s32.totalorder %s786_s17, 1  ;;  %p119_p7 = scmp.eq.s32.totalorder %s114_s23, 0 }
   0xb   : > { %p862_p8 = por %p138_p5, %p137_p3  ;;  %p176_p9 = scmp.lt.s32.totalorder %s786_s17, 3 }
   0xc   : > { %s868_s25 = scalar_select %p119_p7, %s774_s14, %s121_s21  }
   0xd   : > { %p177_p10 = pnand %p609_p6, %p176_p9 }
   0xe   : > { %p206_p11 = scmp.lt.s32.totalorder (!%p177_p10), %s778_s15, 1  ;;  %v788_v0 = vmov (!%p177_p10), 0.0   ;;  %vm228_vm0 = vcmask (!%p177_p10), 125952   ;;  %vm789_vm1 = vmmov (!%p177_p10), 0   ;;  %v790_v2 = vmov (!%p177_p10), 0   ;;  %s791_s4 = smov (!%p177_p10), 4  }
   0xf   : > { %180 = sbr.rel (%p177_p10) target bundleno = 390 (0x186), region = 32  ;;  %223 = vst [vmem:[#allocation2] sm:$0xf] (!%p177_p10), %v788_v0  ;;  %630 = vmatprep.subr.mxu0 (!%p177_p10), %v788_v0  ;;  %635 = vmatprep.subr.mxu1 (!%p177_p10), %v788_v0  ;;  %s792_s5 = smov (!%p177_p10), 2   ;;  %v489_v5 = vld [vmem:[%s948_s2] sm:$0xff] (!%p177_p10)  ;;  %vm240_vm2 = vcmask (!%p177_p10), 15360  }
  0x10   : > { %632 = vmatprep.mubr.msk.f32.mxu0 (!%p177_p10), %vm789_vm1, %v788_v0  ;;  %637 = vmatprep.mubr.msk.f32.mxu1 (!%p177_p10), %vm789_vm1, %v788_v0  ;;  %s793_s8 = smov (!%p177_p10), 112   ;;  %vm242_vm3 = vcmask (!%p177_p10), 31744   ;;  %vm246_vm4 = vcmask (!%p177_p10), 1043456   ;;  %v612_v11 = vld [vmem:[%s947_s1 + $0x8] sm:$0xff] (!%p177_p10)  ;;  %v231_v14 = vld [vmem:[%s947_s1] sm:$0xff] (!%p177_p10)  ;;  %v617_v16 = vld [vmem:[%s947_s1 + $0x10] sm:$0xff] (!%p177_p10) }
  0x11   : > { %706 = vset.pattern.permute.xlu0 (!%p177_p10), %v790_v2  ;;  %vm487_vm5 = vcmask (!%p177_p10), 1044448   ;;  %s203_s23 = sand.u32 (!%p177_p10), 1, %s770_s13   ;;  %vm496_vm6 = vcmask (!%p177_p10), 130048  }
  0x12   : > { %s499_s6 = scalar_lea.sflag (!%p177_p10), [#allocation4], %s203_s23 }
  0x16   : > { %s207_s26 = scalar_select %p206_p11, %s778_s15, 1 }
  0x18   : > { %s611_s27 = sshll.u32 %s207_s26, 2  ;;  %s610_s26 = sshll.u32 %s203_s23, 3 }
  0x19   : > { %s212_s30 = scalar_lea.vmem %s946_s0, %s611_s27  ;;  %s621_s27 = sshll.u32 %s778_s15, 7 }
  0x1a   : > { %v227_v1 = vld [vmem:[%s212_s30] sm:$0xf]  ;;  %s205_s28 = scalar_lea.vmem [#allocation3], %s610_s26  ;;  %s794_s15 = smov [#allocation3]  }
  0x1b   : > { %229 = vst.msk [vmem:[#allocation2 + $0x4] sm:$0xf] %vm228_vm0, %v227_v1  ;;  %s514_s29 = sshll.u32 %s205_s28, 4  ;;  %s901_s29 = int_to_ptr.vmem [resolvable:$true] %s514_s29 }
  0x1c   : > { %s708_s7 = scalar_lea.vmem %s901_s29, 128 }
  0x1d   : > { %p709_p12 = scmp.ne.s32.totalorder %s901_s29, %s708_s7 }
  0x1f   : > { %p710_p13 = pnand %p709_p12, %p855_p4 }
  0x21   : > { %p711_p0 = pneg %p710_p13 }
  0x22   : > { %v230_v3 = vld [vmem:[#allocation2] sm:$0xff] }
  0x23   : > { %319 = vrot.lane.b32.xlu1 %v230_v3, %s791_s4  ;;  %236 = vrot.lane.b32.xlu0 %v230_v3, %s792_s5  ;;  %v235_v4 = vcombine.high %v230_v3, %v230_v3  ;;  %v482_v6 = vld [vmem:[#allocation2 + $0x4] sm:$0xf] }
  0x24   : > { %v399_v15 = vld [vmem:[#allocation2 + $0x4] sm:$0xf] }
  0x27   : > { %321 = vrot.lane.b32.xlu1 %v235_v4, %s791_s4  ;;  %238 = vrot.lane.b32.xlu0 %v235_v4, %s792_s5  ;;  %s899_s5 = scalar_lea.hbm %s949_s3, %s621_s27 }
  0x2b   : > { %492 = vperm.xlu0 %706, %v489_v5   ;;  %484 = vrot.lane.b32.xlu1 %v482_v6, %s793_s8  ;;  %s712_s8 = sshll.u32 %s794_s15, 4  ;;  %s713_s8 = int_to_ptr.vmem [resolvable:$false] %s712_s8 }
  0x2c   : > { %s714_s9 = scalar_lea.vmem %s713_s8, 256  ;;  %p715_p1 = scmp.lt.s32.totalorder %s901_s29, %s713_s8 }
  0x2d   : > { %p716_p2 = scmp.lt.s32.totalorder %s714_s9, %s708_s7 }
  0x2f   : > { %p717_p3 = por %p716_p2, %p715_p1 }
  0x31   : > { %p718_p5 = pnand %p717_p3, %p711_p0 }
  0x95   : > { %v320_v7 = vpop.permute.xlu1 %319  ;;  %v237_v8 = vpop.permute.xlu0 %236 }
  0x99   : > { %v322_v9 = vpop.permute.xlu1 %321  ;;  %v239_v10 = vpop.permute.xlu0 %238 }
  0x9a   : > { %v241_v12 = vsel %vm240_vm2, %v237_v8, %v239_v10  ;;  %v323_v13 = vsel %vm242_vm3, %v320_v7, %v322_v9 }
  0x9b   : > { %631 = vmatpush3.msk.msra.mxu0 %vm246_vm4, %v241_v12  ;;  %636 = vmatpush3.msk.msra.mxu1 %vm246_vm4, %v323_v13 }
  0x9c   : > { %633 = vmatmul.mubr.msk.f32.vlgmr.msra.gmra.mrb[0].mxu0 %vm242_vm3, %v612_v11  ;;  %640 = vmatprep.subr.mxu0 %v788_v0 }
  0x9d   : > { %638 = vmatmul.mubr.msk.f32.vlgmr.msra.gmra.mrb[0].mxu1 %vm242_vm3, %v231_v14  ;;  %641 = vmatpush3.msk.msra.mxu0 %vm246_vm4, %v399_v15  ;;  %v485_v17 = vpop.permute.xlu1 %484 }
  0x9e   : > { %642 = vmatprep.mubr.msk.f32.mxu0 %vm789_vm1, %v788_v0  ;;  %488 = vst.msk [vmem:[#allocation2] sm:$0xf] %vm487_vm5, %v485_v17 }
  0xa0   : > { %643 = vmatmul.mubr.msk.f32.vlgmr.msra.gmra.mrb[2].mxu0 %vm242_vm3, %v617_v16 }
  0xaa   : > { %v493_v24 = vpop.permute.xlu0 %492 }
 0x16f   : > { %v315_v18 = vpop.f32.mrb[0].mxu0 }
 0x170   : > { %v634_v19 = vpop.f32.mrb[1].mxu0  ;;  %v395_v20 = vpop.f32.mrb[0].mxu1 }
 0x171   : > { %v396_v21 = vadd.f32 %v395_v20, %v315_v18  ;;  %v639_v22 = vpop.f32.mrb[1].mxu1 }
 0x173   : > { %v474_v23 = vpop.f32.mrb[2].mxu0 }
 0x174   : > { %v478_v25 = vadd.f32 %v474_v23, %v396_v21  ;;  %v644_v26 = vpop.f32.mrb[3].mxu0 }
 0x176   : > { %v495_v27 = vadd.f32 %v493_v24, %v478_v25 }
 0x178   : > { %497 = vst.msk [vmem:[%s205_s28] sm:$0xff] %vm496_vm6, %v495_v27 }
 0x179   : > { %721 = shalt.err (!%p718_p5)
}
 0x17a   : > { %s722_s10 = scalar_lea.hbm %s899_s5, 128  ;;  %s726_s19 = scalar_lea.hbm %s949_s3, 256 }
 0x17b   : > { %p723_p6 = scmp.ne.s32.totalorder %s899_s5, %s722_s10  ;;  %p727_p10 = scmp.lt.u32.totalorder %s899_s5, %s949_s3 }
 0x17c   : > { %p728_p11 = scmp.lt.u32.totalorder %s726_s19, %s722_s10  ;;  %p730_p13 = scmp.lt.u32.totalorder %s722_s10, %s899_s5 }
 0x17d   : > { %p724_p7 = pnand %p723_p6, %p855_p4 }
 0x17e   : > { %p729_p12 = por %p728_p11, %p727_p10 }
 0x17f   : > { %p725_p9 = pneg %p724_p7 }
 0x180   : > { %p731_p0 = por %p730_p13, %p729_p12 }
 0x182   : > { %p732_p1 = pnand %p731_p0, %p725_p9 }
 0x184   : > { %735 = shalt.err (!%p732_p1)
}
 0x185   : > { %645 = dma.vmem_to_hbm [thread:$0]  (%p855_p4), %s901_s29, 128, %s899_s5, %s499_s6  }
 0x186 PF: > { %p651_p2 = scmp.ge.s32.totalorder %s786_s17, 2  ;;  %s526_s26 = sand.u32 1, %s766_s12  }
 0x187   : > { %s527_s27 = scalar_lea.sflag [#allocation4], %s526_s26 }
 0x188   : > { %p648_p3 = pnand %p651_p2, %p862_p8 }
 0x18a   : > { %761 = dma.done.wait (!%p648_p3), %s527_s27, 128  }
 0x18b   : > { %763 = vsyncadd (!%p648_p3), %s527_s27, 4294967168  ;;  %s16_s17 = sadd.s32 1, %s786_s17   ;;  %s952_s12 = smov %s770_s13 }
 0x18c   : > { %p13_p5 = scmp.ge.s32.totalorder %s16_s17, 4   ;;  %s953_s13 = smov %s774_s14 }
 0x18d   : > { %s954_s14 = smov %s868_s25  ;;  %s955_s15 = smov %s782_s16 }
 0x18e   : > { %s956_s16 = smov %s958_s20  ;;  %15 = sbr.rel (!%p13_p5) target bundleno = 4 (0x4), region = 84 }
 0x195   :  { %532 = vsyncpa [#allocation4], 1 }
 0x196   :  { %534 = vsyncpa [#allocation4 + $0x1], 1 }

</bundles_post_ra>
